<compile_context>
chip_gen: v5e
topology: v5e:2x2
jax: 0.10.0
libtpu: 0.0.40
codegen_flags: <defaults>
</compile_context>

<pallas_src>
import functools
import math

import jax
import jax.numpy as jnp
from jax.experimental import pallas as pl
from jax.experimental.pallas import tpu as pltpu


def _round_up(n, m):
    return ((n + m - 1) // m) * m


def _make_fused_tcn_kernel(level_cfgs, ksize, bt):
    """Build the fused kernel for a fixed (static) network geometry."""
    num_levels = len(level_cfgs)

    def kernel(*refs):
        # refs layout:
        #   [0]                      x_ref          (bt, C_in0, L0)
        #   [1 + 2*i], [2 + 2*i]     w_i, b_i       packed conv weight / bias per level
        #   [1 + 2*num_levels]       head_w         (output_size, C_last)
        #   [2 + 2*num_levels]       head_b         (output_size, 1)
        #   [3 + 2*num_levels]       o_ref          (1, output_size, bt)
        #   [4 + 2*num_levels:]      im2col scratch per level
        x_ref = refs[0]
        head_w_ref = refs[1 + 2 * num_levels]
        head_b_ref = refs[2 + 2 * num_levels]
        o_ref = refs[3 + 2 * num_levels]
        scratch = refs[4 + 2 * num_levels:]

        h = None                                     # packed activation (C, bt*l)
        for i, cfg in enumerate(level_cfgs):
            c_in = cfg["c_in"]
            cp = cfg["c_in_pad"]
            l_in = cfg["l_in"]
            l_out = cfg["l_out"]
            dil = cfg["dilation"]
            pad = cfg["pad"]
            w_ref = refs[1 + 2 * i]                  # (C_out, K*cp)
            b_ref = refs[2 + 2 * i]                  # (C_out, 1)
            xcol = scratch[i]                        # (K*cp, bt*l_out) VMEM scratch

            # In-kernel zero padding + im2col (stride 1, symmetric pad).
            # For each (tap j, sample b) the (cp, l_out) block is fully written:
            #   * data region   rows [0, c_in), cols [t0, t0+l_in)  <- activation copy
            #   * pad columns   cols [0, t0) and [t0+l_in, l_out)   <- zero stripes
            #   * sublane pad   rows [c_in, cp) over the data cols  <- zero stripe
            # so no full-buffer memset is needed and no stale VMEM can leak in.
            for j in range(ksize):
                t0 = pad - j * dil                   # static, always >= 0
                r0 = j * cp
                for b in range(bt):
                    c0 = b * l_out
                    src = x_ref[b] if i == 0 else h[:, b * l_in:(b + 1) * l_in]
                    xcol[r0:r0 + c_in, c0 + t0:c0 + t0 + l_in] = src
                    if t0 > 0:
                        xcol[r0:r0 + cp, c0:c0 + t0] = jnp.zeros((cp, t0), jnp.float32)
                    if j * dil > 0:
                        xcol[r0:r0 + cp, c0 + t0 + l_in:c0 + l_out] = jnp.zeros(
                            (cp, j * dil), jnp.float32)
                    if cp > c_in:
                        xcol[r0 + c_in:r0 + cp, c0 + t0:c0 + t0 + l_in] = jnp.zeros(
                            (cp - c_in, l_in), jnp.float32)

            # Single MXU matmul per level; bias + ReLU fused in the epilogue.
            acc = jnp.dot(w_ref[...], xcol[...],
                          preferred_element_type=jnp.float32,
                          precision=jax.lax.Precision.HIGHEST)
            h = jnp.maximum(acc + b_ref[...], 0.0)   # (C_out, bt*l_out)

        # Fused linear head on the last timestep of every sample only
        # (sliced BEFORE the matmul; columns are already resident in VMEM).
        l_last = level_cfgs[-1]["l_out"]
        if bt == 1:
            hl = h[:, l_last - 1:l_last]             # (C_last, 1)
        else:
            hl = jnp.concatenate(
                [h[:, b * l_last + l_last - 1:b * l_last + l_last] for b in range(bt)],
                axis=1)                              # (C_last, bt)
        y = jnp.dot(head_w_ref[...], hl,
                    preferred_element_type=jnp.float32,
                    precision=jax.lax.Precision.HIGHEST)   # (output_size, bt)
        o_ref[0] = y + head_b_ref[...]               # bias (output_size,1) bcast over bt

    return kernel


def tcn_model_forward(params, x, *, kernel_size, batch_tile=None):
    """x: (B, num_input, L) float32 -> (B, output_size), squeezed like PyTorch."""
    B, c_in0, l0 = x.shape
    K = kernel_size
    conv_params = params["conv"]

    # Batch blocking: `bt` samples per grid step, packed along the matmul lane
    # dim.  Default keeps the grid length at 2 (when B allows) so both v7x
    # TensorCores get work; pass batch_tile=B on v5e/v6e for a single fat step.
    if batch_tile is None:
        num_steps = 2 if B >= 2 else 1
        bt = -(-B // num_steps)
    else:
        bt = max(1, min(int(batch_tile), B))
        num_steps = -(-B // bt)
    b_pad = bt * num_steps
    if b_pad != B:
        x = jnp.concatenate(
            [x, jnp.zeros((b_pad - B, c_in0, l0), x.dtype)], axis=0)

    level_cfgs = []
    packed = []                      # flat list: w2d_0, b2d_0, w2d_1, b2d_1, ...
    in_specs = [pl.BlockSpec((bt, c_in0, l0), lambda s: (s, 0, 0))]
    scratch_shapes = []

    c_in, l_in = c_in0, l0
    for i, (w_koc, bias) in enumerate(conv_params):
        k, c_out, c_in_w = w_koc.shape
        assert k == K and c_in_w == c_in
        dil = 2 ** i
        pad = (K - 1) * dil
        l_out = l_in + pad                          # symmetric pad -> length grows
        cp = _round_up(c_in, 8)                     # 8-sublane-aligned tap blocks

        # Pack the K tap matrices into one (C_out, K*cp) matrix; the zero-filled
        # padding columns multiply the always-zero padded rows of xcol.
        w2d = jnp.zeros((c_out, K * cp), jnp.float32)
        for j in range(K):
            w2d = w2d.at[:, j * cp:j * cp + c_in].set(w_koc[j])
        b2d = bias.reshape(c_out, 1).astype(jnp.float32)

        packed += [w2d, b2d]
        # NOTE: constant-index weight specs are still double-buffered by the
        # pipeliner; at realistic channel counts move them to a one-shot DMA'd
        # scratch to reclaim VMEM (irrelevant at these sizes).
        in_specs += [pl.BlockSpec((c_out, K * cp), lambda s: (0, 0)),
                     pl.BlockSpec((c_out, 1), lambda s: (0, 0))]
        scratch_shapes.append(pltpu.VMEM((K * cp, bt * l_out), jnp.float32))
        level_cfgs.append(dict(c_in=c_in, c_in_pad=cp, c_out=c_out,
                               l_in=l_in, l_out=l_out, dilation=dil, pad=pad))
        c_in, l_in = c_out, l_out

    head_w = params["linear_w"].astype(jnp.float32)     # (output_size, C_last)
    head_b = params["linear_b"].astype(jnp.float32)
    output_size = head_w.shape[0]
    in_specs += [pl.BlockSpec((output_size, c_in), lambda s: (0, 0)),
                 pl.BlockSpec((output_size, 1), lambda s: (0, 0))]

    kernel = _make_fused_tcn_kernel(tuple(level_cfgs), K, bt)

    # Explicit VMEM budget (2x double-buffered x block + 2x weights + scratch +
    # 2x out block) with headroom; clamp to a value safe on every generation.
    f32b = 4
    weight_bytes = sum(int(math.prod(w.shape)) * f32b for w in packed)
    weight_bytes += (output_size * c_in + output_size) * f32b
    scratch_bytes = sum(K * cfg["c_in_pad"] * bt * cfg["l_out"] * f32b
                        for cfg in level_cfgs)
    x_block_bytes = bt * c_in0 * l0 * f32b
    out_block_bytes = output_size * bt * f32b
    budget = 2 * x_block_bytes + 2 * weight_bytes + scratch_bytes + 2 * out_block_bytes
    vmem_limit = int(min(max(2 * budget + (8 << 20), 32 << 20), 64 << 20))

    out3 = pl.pallas_call(
        kernel,
        out_shape=jax.ShapeDtypeStruct((num_steps, output_size, bt), jnp.float32),
        grid_spec=pltpu.PrefetchScalarGridSpec(
            num_scalar_prefetch=0,
            grid=(num_steps,),
            in_specs=in_specs,
            out_specs=pl.BlockSpec((1, output_size, bt), lambda s: (s, 0, 0)),
            scratch_shapes=scratch_shapes,
        ),
        compiler_params=pltpu.CompilerParams(
            dimension_semantics=("parallel",),       # v7x: grid steps split across TCs
            vmem_limit_bytes=vmem_limit),
    )(x, *packed, head_w, head_b.reshape(output_size, 1))

    # (num_steps, output_size, bt) -> (B, output_size); trivial XLA fixup.
    out = jnp.transpose(out3, (0, 2, 1)).reshape(b_pad, output_size)[:B]
    return jnp.squeeze(out)                          # matches output.squeeze()


def init_tcn_params(key, num_input, output_size, num_channels, kernel_size):
    """Deterministic synthetic init (PyTorch-default-like uniform bounds)."""
    params = {"conv": []}
    in_c = num_input
    for out_c in num_channels:
        key, kw, kb = jax.random.split(key, 3)
        bound = 1.0 / float(in_c * kernel_size) ** 0.5
        w = jax.random.uniform(kw, (kernel_size, out_c, in_c), jnp.float32, -bound, bound)
        b = jax.random.uniform(kb, (out_c,), jnp.float32, -bound, bound)
        params["conv"].append((w, b))
        in_c = out_c
    key, kw, kb = jax.random.split(key, 3)
    bound = 1.0 / float(in_c) ** 0.5
    params["linear_w"] = jax.random.uniform(kw, (output_size, in_c), jnp.float32, -bound, bound)
    params["linear_b"] = jax.random.uniform(kb, (output_size,), jnp.float32, -bound, bound)
    return params


def _reference_forward(params, x, *, kernel_size):
    """Pure-JAX (lax.conv) reference of the same forward pass."""
    h = x
    for i, (w_koc, b) in enumerate(params["conv"]):
        dil = 2 ** i
        pad = (kernel_size - 1) * dil
        w_oik = jnp.transpose(w_koc, (1, 2, 0))     # (C_out, C_in, K)
        h = jax.lax.conv_general_dilated(
            h, w_oik, window_strides=(1,), padding=[(pad, pad)],
            rhs_dilation=(dil,), dimension_numbers=("NCH", "OIH", "NCH"),
            precision=jax.lax.Precision.HIGHEST)
        h = jnp.maximum(h + b[None, :, None], 0.0)
    out = jnp.matmul(h[:, :, -1], params["linear_w"].T,
                     precision=jax.lax.Precision.HIGHEST) + params["linear_b"]
    return jnp.squeeze(out)


if __name__ == "__main__":
    batch, num_input, seq_len = 2, 4, 16
    num_channels = [8, 16]
    kernel_size = 2
    output_size = 3
    dropout = 0.0   # nn.Dropout(p=0.0) is the identity — intentionally omitted

    key = jax.random.PRNGKey(0)
    key, kx = jax.random.split(key)
    x = jax.random.normal(kx, (batch, num_input, seq_len), jnp.float32)
    params = init_tcn_params(key, num_input, output_size, num_channels, kernel_size)

    fwd = jax.jit(functools.partial(tcn_model_forward, kernel_size=kernel_size))
    out = fwd(params, x)
    jax.block_until_ready(out)

    ref = _reference_forward(params, x, kernel_size=kernel_size)
    assert out.shape == (batch, output_size)
    assert jnp.allclose(out, ref, rtol=1e-2, atol=1e-2)
    print("KERNEL_OK")
</pallas_src>

<mosaic_0001>
module attributes {stable_mosaic.version = 11 : i64} {
  func.func @kernel(%arg0: i32, %arg1: memref<1x4x16xf32, #tpu.memory_space<vmem>>, %arg2: memref<8x16xf32, #tpu.memory_space<vmem>>, %arg3: memref<8x1xf32, #tpu.memory_space<vmem>>, %arg4: memref<16x16xf32, #tpu.memory_space<vmem>>, %arg5: memref<16x1xf32, #tpu.memory_space<vmem>>, %arg6: memref<3x16xf32, #tpu.memory_space<vmem>>, %arg7: memref<3x1xf32, #tpu.memory_space<vmem>>, %arg8: memref<1x3x1xf32, #tpu.memory_space<vmem>>, %arg9: memref<16x17xf32, #tpu.memory_space<vmem>>, %arg10: memref<16x19xf32, #tpu.memory_space<vmem>>) attributes {dimension_semantics = [#tpu.dimension_semantics<parallel>], iteration_bounds = array<i64: 2>, scalar_prefetch = 0 : i64, scratch_operands = 2 : i64, tpu.core_type = #tpu.core_type<tc>, window_params = [{transform_indices = @transform_0, window_bounds = array<i64: 1, 4, 16>}, {pipeline_mode = #tpu.pipeline_mode<synchronous>, transform_indices = @transform_1, window_bounds = array<i64: 8, 16>}, {pipeline_mode = #tpu.pipeline_mode<synchronous>, transform_indices = @transform_2, window_bounds = array<i64: 8, 1>}, {pipeline_mode = #tpu.pipeline_mode<synchronous>, transform_indices = @transform_3, window_bounds = array<i64: 16, 16>}, {pipeline_mode = #tpu.pipeline_mode<synchronous>, transform_indices = @transform_4, window_bounds = array<i64: 16, 1>}, {pipeline_mode = #tpu.pipeline_mode<synchronous>, transform_indices = @transform_5, window_bounds = array<i64: 3, 16>}, {pipeline_mode = #tpu.pipeline_mode<synchronous>, transform_indices = @transform_6, window_bounds = array<i64: 3, 1>}, {transform_indices = @transform_7, window_bounds = array<i64: 1, 3, 1>}]} {
    %c0 = arith.constant 0 : index
    %c0_0 = arith.constant 0 : index
    %c0_1 = arith.constant 0 : index
    %0 = vector.load %arg1[%c0, %c0_0, %c0_1] : memref<1x4x16xf32, #tpu.memory_space<vmem>>, vector<1x4x16xf32>
    %1 = vector.shape_cast %0 : vector<1x4x16xf32> to vector<4x16xf32>
    %c0_2 = arith.constant 0 : index
    %c1 = arith.constant 1 : index
    %2 = vector.load %arg9[%c0_2, %c1] : memref<16x17xf32, #tpu.memory_space<vmem>>, vector<4x16xf32>
    tpu.vector_store %arg9[%c0_2, %c1], %1 {strides = array<i32>} : memref<16x17xf32, #tpu.memory_space<vmem>>, vector<4x16xf32>,
    %cst = arith.constant 0.000000e+00 : f32
    %3 = vector.broadcast %cst : f32 to vector<8x1xf32>
    %c0_3 = arith.constant 0 : index
    %c0_4 = arith.constant 0 : index
    %4 = vector.load %arg9[%c0_3, %c0_4] : memref<16x17xf32, #tpu.memory_space<vmem>>, vector<8x1xf32>
    tpu.vector_store %arg9[%c0_3, %c0_4], %3 {strides = array<i32>} : memref<16x17xf32, #tpu.memory_space<vmem>>, vector<8x1xf32>,
    %cst_5 = arith.constant 0.000000e+00 : f32
    %5 = vector.broadcast %cst_5 : f32 to vector<4x16xf32>
    %c4 = arith.constant 4 : index
    %c1_6 = arith.constant 1 : index
    %6 = vector.load %arg9[%c4, %c1_6] : memref<16x17xf32, #tpu.memory_space<vmem>>, vector<4x16xf32>
    tpu.vector_store %arg9[%c4, %c1_6], %5 {strides = array<i32>} : memref<16x17xf32, #tpu.memory_space<vmem>>, vector<4x16xf32>,
    %c0_7 = arith.constant 0 : index
    %c0_8 = arith.constant 0 : index
    %c0_9 = arith.constant 0 : index
    %7 = vector.load %arg1[%c0_7, %c0_8, %c0_9] : memref<1x4x16xf32, #tpu.memory_space<vmem>>, vector<1x4x16xf32>
    %8 = vector.shape_cast %7 : vector<1x4x16xf32> to vector<4x16xf32>
    %c8 = arith.constant 8 : index
    %c0_10 = arith.constant 0 : index
    %9 = vector.load %arg9[%c8, %c0_10] : memref<16x17xf32, #tpu.memory_space<vmem>>, vector<4x16xf32>
    tpu.vector_store %arg9[%c8, %c0_10], %8 {strides = array<i32>} : memref<16x17xf32, #tpu.memory_space<vmem>>, vector<4x16xf32>,
    %cst_11 = arith.constant 0.000000e+00 : f32
    %10 = vector.broadcast %cst_11 : f32 to vector<8x1xf32>
    %c8_12 = arith.constant 8 : index
    %c16 = arith.constant 16 : index
    %11 = vector.load %arg9[%c8_12, %c16] : memref<16x17xf32, #tpu.memory_space<vmem>>, vector<8x1xf32>
    tpu.vector_store %arg9[%c8_12, %c16], %10 {strides = array<i32>} : memref<16x17xf32, #tpu.memory_space<vmem>>, vector<8x1xf32>,
    %cst_13 = arith.constant 0.000000e+00 : f32
    %12 = vector.broadcast %cst_13 : f32 to vector<4x16xf32>
    %c12 = arith.constant 12 : index
    %c0_14 = arith.constant 0 : index
    %13 = vector.load %arg9[%c12, %c0_14] : memref<16x17xf32, #tpu.memory_space<vmem>>, vector<4x16xf32>
    tpu.vector_store %arg9[%c12, %c0_14], %12 {strides = array<i32>} : memref<16x17xf32, #tpu.memory_space<vmem>>, vector<4x16xf32>,
    %c0_15 = arith.constant 0 : index
    %c0_16 = arith.constant 0 : index
    %14 = vector.load %arg2[%c0_15, %c0_16] : memref<8x16xf32, #tpu.memory_space<vmem>>, vector<8x16xf32>
    %c0_17 = arith.constant 0 : index
    %c0_18 = arith.constant 0 : index
    %15 = vector.load %arg9[%c0_17, %c0_18] : memref<16x17xf32, #tpu.memory_space<vmem>>, vector<16x17xf32>
    %cst_19 = arith.constant dense<0.000000e+00> : vector<8x17xf32>
    %16 = tpu.matmul %14, %15, %cst_19 {dimension_numbers = #tpu.dot_dimension_numbers<[1], [0], [0], [1], [0, 0, 1, 1], [], []>, precision = #tpu.contract_precision<fp32>} : vector<8x16xf32>, vector<16x17xf32>, vector<8x17xf32> -> vector<8x17xf32>
    %c0_20 = arith.constant 0 : index
    %c0_21 = arith.constant 0 : index
    %17 = vector.load %arg3[%c0_20, %c0_21] : memref<8x1xf32, #tpu.memory_space<vmem>>, vector<8x1xf32>
    %18 = vector.broadcast %17 : vector<8x1xf32> to vector<8x17xf32>
    %19 = arith.addf %16, %18 : vector<8x17xf32>
    %cst_22 = arith.constant 0.000000e+00 : f32
    %20 = vector.broadcast %cst_22 : f32 to vector<8x17xf32>
    %21 = arith.maximumf %19, %20 : vector<8x17xf32>
    %c0_23 = arith.constant 0 : index
    %c2 = arith.constant 2 : index
    %22 = vector.load %arg10[%c0_23, %c2] : memref<16x19xf32, #tpu.memory_space<vmem>>, vector<8x17xf32>
    tpu.vector_store %arg10[%c0_23, %c2], %21 {strides = array<i32>} : memref<16x19xf32, #tpu.memory_space<vmem>>, vector<8x17xf32>,
    %cst_24 = arith.constant 0.000000e+00 : f32
    %23 = vector.broadcast %cst_24 : f32 to vector<8x2xf32>
    %c0_25 = arith.constant 0 : index
    %c0_26 = arith.constant 0 : index
    %24 = vector.load %arg10[%c0_25, %c0_26] : memref<16x19xf32, #tpu.memory_space<vmem>>, vector<8x2xf32>
    tpu.vector_store %arg10[%c0_25, %c0_26], %23 {strides = array<i32>} : memref<16x19xf32, #tpu.memory_space<vmem>>, vector<8x2xf32>,
    %c8_27 = arith.constant 8 : index
    %c0_28 = arith.constant 0 : index
    %25 = vector.load %arg10[%c8_27, %c0_28] : memref<16x19xf32, #tpu.memory_space<vmem>>, vector<8x17xf32>
    tpu.vector_store %arg10[%c8_27, %c0_28], %21 {strides = array<i32>} : memref<16x19xf32, #tpu.memory_space<vmem>>, vector<8x17xf32>,
    %cst_29 = arith.constant 0.000000e+00 : f32
    %26 = vector.broadcast %cst_29 : f32 to vector<8x2xf32>
    %c8_30 = arith.constant 8 : index
    %c17 = arith.constant 17 : index
    %27 = vector.load %arg10[%c8_30, %c17] : memref<16x19xf32, #tpu.memory_space<vmem>>, vector<8x2xf32>
    tpu.vector_store %arg10[%c8_30, %c17], %26 {strides = array<i32>} : memref<16x19xf32, #tpu.memory_space<vmem>>, vector<8x2xf32>,
    %c0_31 = arith.constant 0 : index
    %c0_32 = arith.constant 0 : index
    %28 = vector.load %arg4[%c0_31, %c0_32] : memref<16x16xf32, #tpu.memory_space<vmem>>, vector<16x16xf32>
    %c0_33 = arith.constant 0 : index
    %c0_34 = arith.constant 0 : index
    %29 = vector.load %arg10[%c0_33, %c0_34] : memref<16x19xf32, #tpu.memory_space<vmem>>, vector<16x19xf32>
    %cst_35 = arith.constant dense<0.000000e+00> : vector<16x19xf32>
    %30 = tpu.matmul %28, %29, %cst_35 {dimension_numbers = #tpu.dot_dimension_numbers<[1], [0], [0], [1], [0, 0, 1, 1], [], []>, precision = #tpu.contract_precision<fp32>} : vector<16x16xf32>, vector<16x19xf32>, vector<16x19xf32> -> vector<16x19xf32>
    %c0_36 = arith.constant 0 : index
    %c0_37 = arith.constant 0 : index
    %31 = vector.load %arg5[%c0_36, %c0_37] : memref<16x1xf32, #tpu.memory_space<vmem>>, vector<16x1xf32>
    %32 = vector.broadcast %31 : vector<16x1xf32> to vector<16x19xf32>
    %33 = arith.addf %30, %32 : vector<16x19xf32>
    %cst_38 = arith.constant 0.000000e+00 : f32
    %34 = vector.broadcast %cst_38 : f32 to vector<16x19xf32>
    %35 = arith.maximumf %33, %34 : vector<16x19xf32>
    %36 = vector.extract_strided_slice %35 {offsets = [0, 18], sizes = [16, 1], strides = [1, 1]} : vector<16x19xf32> to vector<16x1xf32>
    %c0_39 = arith.constant 0 : index
    %c0_40 = arith.constant 0 : index
    %37 = vector.load %arg6[%c0_39, %c0_40] : memref<3x16xf32, #tpu.memory_space<vmem>>, vector<3x16xf32>
    %cst_41 = arith.constant dense<0.000000e+00> : vector<3x1xf32>
    %38 = tpu.matmul %37, %36, %cst_41 {dimension_numbers = #tpu.dot_dimension_numbers<[1], [0], [0], [1], [0, 0, 1, 1], [], []>, precision = #tpu.contract_precision<fp32>} : vector<3x16xf32>, vector<16x1xf32>, vector<3x1xf32> -> vector<3x1xf32>
    %c0_42 = arith.constant 0 : index
    %c0_43 = arith.constant 0 : index
    %39 = vector.load %arg7[%c0_42, %c0_43] : memref<3x1xf32, #tpu.memory_space<vmem>>, vector<3x1xf32>
    %40 = arith.addf %38, %39 : vector<3x1xf32>
    %c0_44 = arith.constant 0 : index
    %c0_45 = arith.constant 0 : index
    %c0_46 = arith.constant 0 : index
    %41 = vector.load %arg8[%c0_44, %c0_45, %c0_46] : memref<1x3x1xf32, #tpu.memory_space<vmem>>, vector<1x3x1xf32>
    %42 = vector.shape_cast %41 : vector<1x3x1xf32> to vector<3x1xf32>
    %43 = vector.shape_cast %40 : vector<3x1xf32> to vector<1x3x1xf32>
    tpu.vector_store %arg8[%c0_44, %c0_45, %c0_46], %43 {strides = array<i32>} : memref<1x3x1xf32, #tpu.memory_space<vmem>>, vector<1x3x1xf32>,
    return
  }
  func.func @transform_0(%arg0: i32) -> (i32, i32, i32) {
    %c0_i32 = arith.constant 0 : i32
    %c0_i32_0 = arith.constant 0 : i32
    %c0_i32_1 = arith.constant 0 : i32
    return %arg0, %c0_i32, %c0_i32_0 : i32, i32, i32
  }
  func.func @transform_1(%arg0: i32) -> (i32, i32) {
    %c0_i32 = arith.constant 0 : i32
    %c0_i32_0 = arith.constant 0 : i32
    %c0_i32_1 = arith.constant 0 : i32
    return %c0_i32, %c0_i32_0 : i32, i32
  }
  func.func @transform_2(%arg0: i32) -> (i32, i32) {
    %c0_i32 = arith.constant 0 : i32
    %c0_i32_0 = arith.constant 0 : i32
    %c0_i32_1 = arith.constant 0 : i32
    return %c0_i32, %c0_i32_0 : i32, i32
  }
  func.func @transform_3(%arg0: i32) -> (i32, i32) {
    %c0_i32 = arith.constant 0 : i32
    %c0_i32_0 = arith.constant 0 : i32
    %c0_i32_1 = arith.constant 0 : i32
    return %c0_i32, %c0_i32_0 : i32, i32
  }
  func.func @transform_4(%arg0: i32) -> (i32, i32) {
    %c0_i32 = arith.constant 0 : i32
    %c0_i32_0 = arith.constant 0 : i32
    %c0_i32_1 = arith.constant 0 : i32
    return %c0_i32, %c0_i32_0 : i32, i32
  }
  func.func @transform_5(%arg0: i32) -> (i32, i32) {
    %c0_i32 = arith.constant 0 : i32
    %c0_i32_0 = arith.constant 0 : i32
    %c0_i32_1 = arith.constant 0 : i32
    return %c0_i32, %c0_i32_0 : i32, i32
  }
  func.func @transform_6(%arg0: i32) -> (i32, i32) {
    %c0_i32 = arith.constant 0 : i32
    %c0_i32_0 = arith.constant 0 : i32
    %c0_i32_1 = arith.constant 0 : i32
    return %c0_i32, %c0_i32_0 : i32, i32
  }
  func.func @transform_7(%arg0: i32) -> (i32, i32, i32) {
    %c0_i32 = arith.constant 0 : i32
    %c0_i32_0 = arith.constant 0 : i32
    %c0_i32_1 = arith.constant 0 : i32
    return %arg0, %c0_i32, %c0_i32_0 : i32, i32, i32
  }
}

</mosaic_0001>

<bundles_post_ra>
// kernel: tcn_model_forward.1
= control target key start
LH: loop header
LB: loop body
LE: loop exit
PB: predicated region body
PF: predicated region fallthrough
CT: control target
= control target key end

     0   :  { %s994_s24 = smov 0   ;;  %s1052_s0 = inlined_call_operand.vmem [shape: f32[2,4,16], index: 0, kind: input, shape index: {}]   ;;  %s1053_s1 = inlined_call_operand.vmem [shape: f32[8,16], index: 1, kind: input, shape index: {}]   ;;  %s1054_s2 = inlined_call_operand.vmem [shape: f32[8,1], index: 2, kind: input, shape index: {}]   ;;  %s1055_s3 = inlined_call_operand.vmem [shape: f32[16,16], index: 3, kind: input, shape index: {}]   ;;  %s1056_s4 = inlined_call_operand.vmem [shape: f32[16,1], index: 4, kind: input, shape index: {}]   ;;  %s1057_s5 = inlined_call_operand.vmem [shape: f32[3,16], index: 5, kind: input, shape index: {}]   ;;  %s1058_s6 = inlined_call_operand.vmem [shape: f32[3,1], index: 6, kind: input, shape index: {}]   ;;  %s1059_s7 = inlined_call_operand.vmem [shape: f32[2,3,1], index: 7, kind: output, shape index: {}]  }
   0x1 LB: > { %s916_s25 = sadd.s32 4294967295, %s947_s24   ;;  %p920_p0 = scmp.ge.s32.totalorder %s947_s24, 1  ;;  %s947_s24 = sphi %s994_s24, %s17_s24  }
   0x2   : > { %p236_p1 = scmp.lt.s32.totalorder %s947_s24, 3 }
   0x4   : > { %p237_p2 = pnand %p920_p0, %p236_p1 }
   0x5   : > { %p266_p3 = scmp.lt.s32.totalorder (!%p237_p2), %s916_s25, 1  ;;  %s949_s30 = smov (!%p237_p2), 1  }
   0x6   : > { %240 = sbr.rel (%p237_p2) target bundleno = 843 (0x34b), region = 48  ;;  %s952_s12 = smov (!%p237_p2), 2  }
   0x7   : > { %s953_s21 = smov (!%p237_p2), 110  }
   0xb   : > { %s1061_s25 = smov (!%p266_p3, %s916_s25), 1  ;;  %vm285_vm0 = vcmask 125952   ;;  %vm287_vm1 = vcmask 138368   ;;  %v950_v2 = vmov 0.0   ;;  %v290_v9 = vld [vmem:[%s1053_s1] sm:$0xff]  ;;  %vm299_vm2 = vcmask 130048  }
   0xc   : > { %s921_s26 = sshll.u32 %s1061_s25, 2  ;;  %v301_v10 = vsel %vm299_vm2, %v290_v9, 0  ;;  %v951_v12 = vmov 0   ;;  %vm279_vm3 = vcmask 134152   ;;  %v293_v14 = vld [vmem:[%s1054_s2] sm:$0xff]  ;;  %vm281_vm4 = vcmask 7168  }
   0xd   : > { %s269_s29 = scalar_lea.vmem %s1052_s0, %s921_s26  ;;  %v321_v11 = vand.u32 4294901760, %v301_v10  ;;  %938 = vset.pattern.permute.xlu0 %v951_v12  ;;  %939 = vset.pattern.permute.xlu1 %v951_v12  ;;  %vm471_vm5 = vcmask 138240   ;;  %vm473_vm6 = vcmask 154760   ;;  %v475_v45 = vld [vmem:[%s1055_s3] sm:$0xff]  ;;  %v476_v48 = vld [vmem:[%s1055_s3 + $0x8] sm:$0xff]  ;;  %vm467_vm7 = vcmask 154640   ;;  %s273_s8 = scalar_lea.vmem %s1059_s7, %s921_s26 }
   0xe   : > { %v274_v0 = vld [vmem:[%s269_s29] sm:$0xf]  ;;  %940 = vset.pattern.permute.xlu2 %v951_v12  ;;  %v492_v46 = vsel %vm299_vm2, %v475_v45, 0  ;;  %v495_v50 = vsel %vm299_vm2, %v476_v48, 0  ;;  %vm469_vm8 = vcmask 15360   ;;  %v480_v56 = vld [vmem:[%s1056_s4 + $0x8] sm:$0xff] }
   0xf   : > { %v284_v1 = vld [vmem:[%s269_s29] sm:$0xf]  ;;  %276 = vrot.lane.b32.xlu0 %v274_v0, %s949_s30  ;;  %v322_v13 = vsub.f32 %v301_v10, %v321_v11  ;;  %v515_v47 = vand.u32 4294901760, %v492_v46  ;;  %v523_v53 = vand.u32 4294901760, %v495_v50  ;;  %vm861_vm9 = vcmask 2048  }
  0x10   : > { %286 = vst.msk [vmem:[#allocation2 + $0x8] sm:$0xf] %vm285_vm0, %v284_v1  ;;  %v479_v63 = vld [vmem:[%s1056_s4] sm:$0xff] }
  0x11   : > { %288 = vst.msk [vmem:[#allocation2 + $0x8] sm:$0xff] %vm287_vm1, %v950_v2  ;;  %v323_v16 = vand.u32 4294901760, %v322_v13  ;;  %v516_v49 = vsub.f32 %v492_v46, %v515_v47  ;;  %v524_v55 = vsub.f32 %v495_v50, %v523_v53  ;;  %483 = vperm.xlu2 %940, %v479_v63  }
  0x12   : > { %289 = vst.msk [vmem:[#allocation2 + $0xc] sm:$0xf] %vm285_vm0, %v950_v2 }
  0x13   : > { %v324_v17 = vsub.f32 %v322_v13, %v323_v16  ;;  %v517_v52 = vand.u32 4294901760, %v516_v49  ;;  %v525_v59 = vand.u32 4294901760, %v524_v55 }
  0x15   : > { %v325_v19 = vand.u32 4294901760, %v324_v17  ;;  %v518_v54 = vsub.f32 %v516_v49, %v517_v52  ;;  %v526_v62 = vsub.f32 %v524_v55, %v525_v59 }
  0x17   : > { %296 = vperm.xlu0 %938, %v293_v14   ;;  %v519_v58 = vand.u32 4294901760, %v518_v54 }
  0x19   : > { %v292_v3 = vld [vmem:[#allocation2 + $0x8] sm:$0xff] }
  0x1a   : > { %v317_v4 = vand.u32 4294901760, %v292_v3 }
  0x1c   : > { %v345_v5 = vsub.f32 %v292_v3, %v317_v4  ;;  %318 = vmatpush.msra.mxu0 %v317_v4  ;;  %402 = vmatpush.msra.mxu3 %v317_v4 }
  0x1e   : > { %377 = vmatpush.msra.mxu2 %v345_v5  ;;  %v346_v6 = vand.u32 4294901760, %v345_v5 }
  0x20   : > { %v347_v7 = vsub.f32 %v345_v5, %v346_v6 }
  0x22   : > { %v348_v8 = vand.u32 4294901760, %v347_v7 }
  0x24   : > { %349 = vmatpush.msra.mxu1 %v348_v8 }
  0x6b   : > { %v484_v5 = vpop.permute.xlu2 %483 }
  0x81   : > { %v277_v15 = vpop.permute.xlu0 %276 }
  0x82   : > { %280 = vst.msk [vmem:[#allocation2] sm:$0xf] %vm279_vm3, %v277_v15 }
  0x83   : > { %282 = vst.msk [vmem:[#allocation2] sm:$0xff] %vm281_vm4, %v950_v2 }
  0x84   : > { %283 = vst.msk [vmem:[#allocation2 + $0x4] sm:$0xf] %vm279_vm3, %v950_v2 }
  0x89   : > { %v297_v26 = vpop.permute.xlu0 %296 }
  0x8b   : > { %v291_v18 = vld [vmem:[#allocation2] sm:$0xff] }
  0x8c   : > { %v319_v20 = vand.u32 4294901760, %v291_v18 }
  0x8e   : > { %v351_v21 = vsub.f32 %v291_v18, %v319_v20  ;;  %320 = vmatpush.msra.mxu0 %v319_v20  ;;  %404 = vmatpush.msra.mxu3 %v319_v20 }
  0x8f   : > { %326 = vmatmul.f32.vlgmr.msra.gmra.mxu0 %v325_v19  ;;  %408 = vmatmul.f32.vlgmr.msra.gmra.mxu3 %v323_v16 }
  0x90   : > { %380 = vmatpush.msra.mxu2 %v351_v21  ;;  %v352_v22 = vand.u32 4294901760, %v351_v21  ;;  %429 = vmatpush.msrb.mxu0 %v346_v6 }
  0x91   : > { %383 = vmatmul.f32.vlgmr.msra.gmra.mxu2 %v322_v13 }
  0x92   : > { %v353_v23 = vsub.f32 %v351_v21, %v352_v22  ;;  %433 = vmatpush.msrb.mxu0 %v352_v22 }
  0x94   : > { %v354_v24 = vand.u32 4294901760, %v353_v23 }
  0x96   : > { %355 = vmatpush.msra.mxu1 %v354_v24 }
  0x97   : > { %357 = vmatmul.f32.vlgmr.msra.gmra.mxu1 %v321_v11  ;;  %435 = vmatmul.f32.vlgmr.msrb.gmra.mxu0 %v321_v11 }
  0x98   : > { %454 = vmatpush.msrb.mxu1 %v317_v4 }
  0x9a   : > { %456 = vmatpush.msrb.mxu1 %v319_v20 }
  0x9f   : > { %458 = vmatmul.f32.vlgmr.msrb.gmra.mxu1 %v321_v11 }
 0x10c   : > { %v327_v25 = vpop.f32.mrf.mxu0 }
 0x10d   : > { %v328_v27 = vadd.f32 %v327_v25, %v297_v26 }
 0x112   : > { %v409_v31 = vpop.f32.mrf.mxu3 }
 0x114   : > { %v358_v28 = vpop.f32.mrf.mxu1  ;;  %v384_v29 = vpop.f32.mrf.mxu2 }
 0x115   : > { %v359_v30 = vadd.f32 %v358_v28, %v328_v27  ;;  %v436_v33 = vpop.f32.mrf.mxu0 }
 0x117   : > { %v385_v32 = vadd.f32 %v384_v29, %v359_v30 }
 0x119   : > { %v410_v34 = vadd.f32 %v409_v31, %v385_v32  ;;  %v689_v32 = vld [vmem:[%s1057_s5] sm:$0x7] }
 0x11b   : > { %v437_v35 = vadd.f32 %v436_v33, %v410_v34  ;;  %v700_v33 = vsel %vm299_vm2, %v689_v32, 0 }
 0x11c   : > { %v459_v36 = vpop.f32.mrf.mxu1 }
 0x11d   : > { %v460_v37 = vadd.f32 %v459_v36, %v437_v35  ;;  %v720_v35 = vand.u32 4294901760, %v700_v33 }
 0x11f   : > { %v462_v38 = vmax.f32 %v460_v37, 0.0 }
 0x121   : > { %472 = vst.msk [vmem:[#allocation3 + $0x8] sm:$0xff] %vm471_vm5, %v462_v38  ;;  %464 = vrot.lane.b32.xlu1 %v462_v38, %s952_s12 }
 0x122   : > { %474 = vst.msk [vmem:[#allocation3 + $0x8] sm:$0xff] %vm473_vm6, %v950_v2 }
 0x129   : > { %v478_v39 = vld [vmem:[#allocation3 + $0x8] sm:$0xff]  ;;  %488 = vperm.xlu1 %939, %v480_v56  }
 0x12a   : > { %v511_v40 = vand.u32 4294901760, %v478_v39 }
 0x12c   : > { %512 = vmatpush.msrb.mxu2 %v511_v40  ;;  %613 = vmatpush.msra.mxu1 %v511_v40  ;;  %v547_v41 = vsub.f32 %v478_v39, %v511_v40  ;;  %v721_v39 = vsub.f32 %v700_v33, %v720_v35 }
 0x12e   : > { %v548_v42 = vand.u32 4294901760, %v547_v41  ;;  %583 = vmatpush.msra.mxu0 %v547_v41 }
 0x130   : > { %v549_v43 = vsub.f32 %v547_v41, %v548_v42 }
 0x132   : > { %v550_v44 = vand.u32 4294901760, %v549_v43 }
 0x134   : > { %551 = vmatpush.msrb.mxu3 %v550_v44 }
 0x193   : > { %v465_v51 = vpop.permute.xlu1 %464 }
 0x194   : > { %468 = vst.msk [vmem:[#allocation3] sm:$0xff] %vm467_vm7, %v465_v51 }
 0x195   : > { %470 = vst.msk [vmem:[#allocation3] sm:$0xff] %vm469_vm8, %v950_v2  ;;  %v527_v2 = vand.u32 4294901760, %v526_v62 }
 0x19b   : > { %v489_v11 = vpop.permute.xlu1 %488 }
 0x19c   : > { %v477_v57 = vld [vmem:[#allocation3] sm:$0xff] }
 0x19d   : > { %v513_v60 = vand.u32 4294901760, %v477_v57 }
 0x19f   : > { %514 = vmatpush.msrb.mxu2 %v513_v60  ;;  %v553_v61 = vsub.f32 %v477_v57, %v513_v60  ;;  %615 = vmatpush.msra.mxu1 %v513_v60 }
 0x1a0   : > { %520 = vmatmul.f32.vlgmr.msrb.gmra.mxu2 %v519_v58  ;;  %619 = vmatmul.f32.vlgmr.msra.gmra.mxu1 %v517_v52  ;;  %v690_v52 = vld [vmem:[%s1058_s6] sm:$0x7] }
 0x1a1   : > { %v554_v0 = vand.u32 4294901760, %v553_v61  ;;  %646 = vmatpush.msra.mxu2 %v548_v42  ;;  %586 = vmatpush.msra.mxu0 %v553_v61  ;;  %v722_v42 = vand.u32 4294901760, %v721_v39 }
 0x1a2   : > { %589 = vmatmul.f32.vlgmr.msra.gmra.mxu0 %v516_v49 }
 0x1a3   : > { %v555_v1 = vsub.f32 %v553_v61, %v554_v0  ;;  %650 = vmatpush.msra.mxu2 %v554_v0  ;;  %v723_v43 = vsub.f32 %v721_v39, %v722_v42 }
 0x1a5   : > { %v556_v3 = vand.u32 4294901760, %v555_v1  ;;  %v724_v46 = vand.u32 4294901760, %v723_v43 }
 0x1a7   : > { %557 = vmatpush.msrb.mxu3 %v556_v3 }
 0x1a8   : > { %528 = vmatmul.f32.gmra.mxu2 %v527_v2  ;;  %559 = vmatmul.f32.vlgmr.msrb.gmra.mxu3 %v515_v47 }
 0x1a9   : > { %675 = vmatpush.msra.mxu3 %v511_v40  ;;  %625 = vmatmul.f32.gmra.mxu1 %v525_v59 }
 0x1aa   : > { %594 = vmatmul.f32.gmra.mxu0 %v524_v55 }
 0x1ab   : > { %677 = vmatpush.msra.mxu3 %v513_v60 }
 0x1b0   : > { %563 = vmatmul.f32.gmra.mxu3 %v523_v53  ;;  %652 = vmatmul.f32.vlgmr.msra.gmra.mxu2 %v515_v47 }
 0x1b8   : > { %656 = vmatmul.f32.gmra.mxu2 %v523_v53  ;;  %679 = vmatmul.f32.vlgmr.msra.gmra.mxu3 %v515_v47 }
 0x1c0   : > { %683 = vmatmul.f32.gmra.mxu3 %v523_v53 }
 0x21d   : > { %v620_v12 = vpop.f32.mrf.mxu1 }
 0x21f   : > { %v590_v9 = vpop.f32.mrf.mxu0 }
 0x223   : > { %v521_v4 = vpop.f32.mrf.mxu2 }
 0x224   : > { %v522_v8 = vadd.f32 %v521_v4, %v484_v5 }
 0x226   : > { %v626_v24 = vpop.f32.mrf.mxu1 }
 0x227   : > { %v595_v19 = vpop.f32.mrf.mxu0 }
 0x22b   : > { %v529_v6 = vpop.f32.mrf.mxu2  ;;  %v560_v7 = vpop.f32.mrf.mxu3 }
 0x22c   : > { %v561_v10 = vadd.f32 %v560_v7, %v522_v8  ;;  %v530_v15 = vadd.f32 %v529_v6, %v489_v11 }
 0x22e   : > { %v591_v14 = vadd.f32 %v590_v9, %v561_v10 }
 0x230   : > { %v621_v17 = vadd.f32 %v620_v12, %v591_v14 }
 0x233   : > { %v564_v13 = vpop.f32.mrf.mxu3  ;;  %v653_v16 = vpop.f32.mrf.mxu2 }
 0x234   : > { %v565_v18 = vadd.f32 %v564_v13, %v530_v15  ;;  %v654_v20 = vadd.f32 %v653_v16, %v621_v17 }
 0x236   : > { %v596_v22 = vadd.f32 %v595_v19, %v565_v18 }
 0x238   : > { %v627_v27 = vadd.f32 %v626_v24, %v596_v22 }
 0x23b   : > { %v680_v21 = vpop.f32.mrf.mxu3  ;;  %v657_v26 = vpop.f32.mrf.mxu2 }
 0x23c   : > { %v681_v23 = vadd.f32 %v680_v21, %v654_v20  ;;  %v658_v28 = vadd.f32 %v657_v26, %v627_v27 }
 0x23e   : > { %v687_v25 = vmax.f32 %v681_v23, 0.0 }
 0x240   : > { %693 = vrot.lane.b32.xlu1 %v687_v25, %s953_s21 }
 0x243   : > { %v684_v29 = vpop.f32.mrf.mxu3 }
 0x244   : > { %v685_v30 = vadd.f32 %v684_v29, %v658_v28 }
 0x246   : > { %v688_v31 = vmax.f32 %v685_v30, 0.0 }
 0x248   : > { %695 = vrot.lane.b32.xlu2 %v688_v31, %s953_s21 }
 0x2a2   : > { %v696_v34 = vpop.permute.xlu2 %695 }
 0x2a3   : > { %v716_v36 = vand.u32 4294901760, %v696_v34 }
 0x2a5   : > { %v744_v37 = vsub.f32 %v696_v34, %v716_v36  ;;  %717 = vmatpush.msrb.mxu0 %v716_v36  ;;  %853 = vmatpush.msrb.mxu3 %v716_v36 }
 0x2a7   : > { %v745_v38 = vand.u32 4294901760, %v744_v37 }
 0x2a9   : > { %v746_v40 = vsub.f32 %v744_v37, %v745_v38  ;;  %828 = vmatpush.msrb.mxu2 %v745_v38 }
 0x2ab   : > { %v747_v41 = vand.u32 4294901760, %v746_v40 }
 0x2ad   : > { %748 = vmatpush.msrb.mxu1 %v747_v41 }
 0x2b2   : > { %v694_v44 = vpop.permute.xlu1 %693 }
 0x2b3   : > { %v718_v45 = vand.u32 4294901760, %v694_v44 }
 0x2b5   : > { %v750_v47 = vsub.f32 %v694_v44, %v718_v45  ;;  %719 = vmatpush.msrb.mxu0 %v718_v45  ;;  %855 = vmatpush.msrb.mxu3 %v718_v45 }
 0x2b6   : > { %857 = vmatmul.f32.vlgmr.msrb.gmra.mxu3 %v720_v35  ;;  %725 = vmatmul.f32.vlgmr.msrb.gmra.mxu0 %v724_v46 }
 0x2b7   : > { %776 = vmatpush.msra.mxu0 %v744_v37  ;;  %v751_v48 = vand.u32 4294901760, %v750_v47 }
 0x2b9   : > { %779 = vmatpush.msra.mxu0 %v750_v47  ;;  %832 = vmatpush.msrb.mxu2 %v751_v48  ;;  %v752_v49 = vsub.f32 %v750_v47, %v751_v48 }
 0x2ba   : > { %834 = vmatmul.f32.vlgmr.msrb.gmra.mxu2 %v720_v35 }
 0x2bb   : > { %v753_v50 = vand.u32 4294901760, %v752_v49 }
 0x2bd   : > { %754 = vmatpush.msrb.mxu1 %v753_v50 }
 0x2be   : > { %756 = vmatmul.f32.vlgmr.msrb.gmra.mxu1 %v720_v35  ;;  %782 = vmatmul.f32.vlgmr.msra.gmra.mxu0 %v721_v39 }
 0x2bf   : > { %801 = vmatpush.msra.mxu1 %v716_v36 }
 0x2c1   : > { %803 = vmatpush.msra.mxu1 %v718_v45 }
 0x2c6   : > { %807 = vmatmul.f32.vlgmr.msra.gmra.mxu1 %v722_v42 }
 0x333   : > { %v726_v51 = vpop.f32.mrf.mxu0 }
 0x334   : > { %v727_v53 = vadd.f32 %v726_v51, %v690_v52 }
 0x339   : > { %v858_v61 = vpop.f32.mrf.mxu3 }
 0x33b   : > { %v757_v54 = vpop.f32.mrf.mxu1  ;;  %v783_v56 = vpop.f32.mrf.mxu0 }
 0x33c   : > { %v758_v55 = vadd.f32 %v757_v54, %v727_v53 }
 0x33d   : > { %v835_v59 = vpop.f32.mrf.mxu2 }
 0x33e   : > { %v784_v57 = vadd.f32 %v783_v56, %v758_v55 }
 0x343   : > { %v808_v58 = vpop.f32.mrf.mxu1 }
 0x344   : > { %v809_v60 = vadd.f32 %v808_v58, %v784_v57 }
 0x346   : > { %v836_v62 = vadd.f32 %v835_v59, %v809_v60 }
 0x348   : > { %v859_v63 = vadd.f32 %v858_v61, %v836_v62 }
 0x34a   : > { %862 = vst.msk [vmem:[%s273_s8] sm:$0x7] %vm861_vm9, %v859_v63 }
 0x34b PF: > { %s17_s24 = sadd.s32 1, %s947_s24  }
 0x34c   : > { %p14_p4 = scmp.ge.s32.totalorder %s17_s24, 4  }
 0x34e   :  { %16 = sbr.rel (!%p14_p4) target bundleno = 1 (0x1), region = 78 }

</bundles_post_ra>
